<compile_context>
chip_gen: v6e
topology: v6e:2x2x1
jax: 0.10.0
libtpu: 0.0.40
codegen_flags: <defaults>
</compile_context>

<pallas_src>
import functools

import jax
import jax.numpy as jnp
from jax.experimental import pallas as pl
from jax.experimental.pallas import tpu as pltpu

_LANES = 128
_MAX_BLOCK_ROWS = 2048  # (2048, 128) f32 block = 1 MiB per input buffer


def _neg_loglik_kernel(preds_ref, targets_ref, out_ref, *, is_modeling_inverse):
    """Accumulates per-element NLL terms into a vreg-sized output partial.

    nll:      sum(targets / preds + log(preds))
    inv nll:  sum(targets * preds - log(preds))
    """
    k = pl.program_id(1)

    @pl.when(k == 0)
    def _():
        out_ref[...] = jnp.zeros_like(out_ref)

    p = preds_ref[...].astype(jnp.float32)
    t = targets_ref[...].astype(jnp.float32)

    if is_modeling_inverse:
        val = t * p - jnp.log(p)
    else:
        val = t / p + jnp.log(p)

    # Fold the (block_rows, 128) tile into one (8, 128) vreg partial via a
    # sublane-aligned reshape + major-axis sum (pure VPU adds, no XLU work).
    folded = val.reshape(-1, 8, _LANES).sum(axis=0)
    out_ref[...] += folded[None]


def _elem_terms(p, t, is_modeling_inverse):
    p = p.astype(jnp.float32)
    t = t.astype(jnp.float32)
    if is_modeling_inverse:
        return t * p - jnp.log(p)
    return t / p + jnp.log(p)


def neg_loglik_loss(preds, targets, is_modeling_inverse=False):
    """Pallas TPU implementation of NegLoglikLoss.forward (returns a scalar)."""
    assert preds.shape == targets.shape, "preds/targets must match in shape"
    n = preds.size

    # Keep native dtype (cast happens in-kernel); flatten is layout-free.
    p_flat = preds.reshape(-1)
    t_flat = targets.reshape(-1)

    rows_total = n // _LANES
    block_rows = min(_MAX_BLOCK_ROWS, (rows_total // 8) * 8)

    total = jnp.zeros((), jnp.float32)
    main_n = 0

    if block_rows >= 8:
        num_blocks = rows_total // block_rows
        # Use both TensorCores (v7x megacore) when the block count splits evenly;
        # on single-TC chips this axis is just an outer sequential loop.
        n_cores = 2 if (num_blocks >= 2 and num_blocks % 2 == 0) else 1
        blocks_per_core = num_blocks // n_cores
        main_rows = num_blocks * block_rows
        main_n = main_rows * _LANES

        p2 = p_flat[:main_n].reshape(main_rows, _LANES)
        t2 = t_flat[:main_n].reshape(main_rows, _LANES)

        kernel = functools.partial(
            _neg_loglik_kernel, is_modeling_inverse=is_modeling_inverse)

        in_map = lambda c, k: (c * blocks_per_core + k, 0)

        partials = pl.pallas_call(
            kernel,
            out_shape=jax.ShapeDtypeStruct((n_cores, 8, _LANES), jnp.float32),
            grid_spec=pltpu.PrefetchScalarGridSpec(
                num_scalar_prefetch=0,
                grid=(n_cores, blocks_per_core),
                in_specs=[
                    pl.BlockSpec((block_rows, _LANES), in_map),
                    pl.BlockSpec((block_rows, _LANES), in_map),
                ],
                out_specs=pl.BlockSpec((1, 8, _LANES), lambda c, k: (c, 0, 0)),
            ),
            compiler_params=pltpu.CompilerParams(
                dimension_semantics=("parallel", "arbitrary")),
        )(p2, t2)
        total = jnp.sum(partials)

    if main_n < n:
        # Tail (< one block of elements) handled with plain jnp; negligible.
        total = total + jnp.sum(
            _elem_terms(p_flat[main_n:], t_flat[main_n:], is_modeling_inverse))

    return total / jnp.float32(n)


def _reference(preds, targets, is_modeling_inverse=False):
    p = preds.astype(jnp.float32)
    t = targets.astype(jnp.float32)
    if is_modeling_inverse:
        return jnp.mean(t * p - jnp.log(p))
    return jnp.mean(t / p + jnp.log(p))


if __name__ == "__main__":
    key = jax.random.PRNGKey(0)
    k1, k2 = jax.random.split(key)

    # preds play the role of predicted variance (must be positive);
    # targets are squared residuals (non-negative). NCHW-like shape.
    shape = (2, 4, 16, 16)
    preds = jax.nn.softplus(jax.random.normal(k1, shape, jnp.float32)) + 1e-3
    targets = jax.random.normal(k2, shape, jnp.float32) ** 2

    ok = True
    for inverse in (False, True):
        got = neg_loglik_loss(preds, targets, is_modeling_inverse=inverse)
        got = jax.block_until_ready(got)
        want = _reference(preds, targets, is_modeling_inverse=inverse)
        if not jnp.allclose(got, want, rtol=1e-5, atol=1e-5):
            ok = False
            print(f"MISMATCH inverse={inverse}: got={got}, want={want}")

    if ok:
        print("KERNEL_OK")
</pallas_src>

<mosaic_0001>
module attributes {stable_mosaic.version = 11 : i64} {
  func.func @_neg_loglik_kernel(%arg0: i32, %arg1: i32, %arg2: memref<16x128xf32, #tpu.memory_space<vmem>>, %arg3: memref<16x128xf32, #tpu.memory_space<vmem>>, %arg4: memref<1x8x128xf32, #tpu.memory_space<vmem>>) attributes {dimension_semantics = [#tpu.dimension_semantics<parallel>, #tpu.dimension_semantics<arbitrary>], iteration_bounds = array<i64: 1, 1>, scalar_prefetch = 0 : i64, scratch_operands = 0 : i64, tpu.core_type = #tpu.core_type<tc>, window_params = [{transform_indices = @transform_0, window_bounds = array<i64: 16, 128>}, {transform_indices = @transform_1, window_bounds = array<i64: 16, 128>}, {transform_indices = @transform_2, window_bounds = array<i64: 1, 8, 128>}]} {
    %c0_i32 = arith.constant 0 : i32
    %0 = arith.cmpi eq, %arg1, %c0_i32 : i32
    %1 = arith.extui %0 : i1 to i32
    %c0_i32_0 = arith.constant 0 : i32
    %2 = arith.cmpi ne, %1, %c0_i32_0 : i32
    scf.if %2 {
      %cst_10 = arith.constant 0.000000e+00 : f32
      %14 = vector.broadcast %cst_10 : f32 to vector<1x8x128xf32>
      %c0_11 = arith.constant 0 : index
      %c0_12 = arith.constant 0 : index
      %c0_13 = arith.constant 0 : index
      %15 = vector.load %arg4[%c0_11, %c0_12, %c0_13] : memref<1x8x128xf32, #tpu.memory_space<vmem>>, vector<1x8x128xf32>
      tpu.vector_store %arg4[%c0_11, %c0_12, %c0_13], %14 {strides = array<i32>} : memref<1x8x128xf32, #tpu.memory_space<vmem>>, vector<1x8x128xf32>,
    } else {
    }
    %c0 = arith.constant 0 : index
    %c0_1 = arith.constant 0 : index
    %3 = vector.load %arg2[%c0, %c0_1] : memref<16x128xf32, #tpu.memory_space<vmem>>, vector<16x128xf32>
    %c0_2 = arith.constant 0 : index
    %c0_3 = arith.constant 0 : index
    %4 = vector.load %arg3[%c0_2, %c0_3] : memref<16x128xf32, #tpu.memory_space<vmem>>, vector<16x128xf32>
    %5 = arith.divf %4, %3 : vector<16x128xf32>
    %6 = math.log %3 : vector<16x128xf32>
    %7 = arith.addf %5, %6 : vector<16x128xf32>
    %8 = vector.shape_cast %7 : vector<16x128xf32> to vector<2x8x128xf32>
    %cst = arith.constant dense<0.000000e+00> : vector<8x128xf32>
    %9 = vector.multi_reduction <add>, %8, %cst [0] : vector<2x8x128xf32> to vector<8x128xf32>
    %c0_4 = arith.constant 0 : index
    %c0_5 = arith.constant 0 : index
    %c0_6 = arith.constant 0 : index
    %10 = vector.load %arg4[%c0_4, %c0_5, %c0_6] : memref<1x8x128xf32, #tpu.memory_space<vmem>>, vector<1x8x128xf32>
    %11 = vector.shape_cast %9 : vector<8x128xf32> to vector<1x8x128xf32>
    %12 = arith.addf %10, %11 : vector<1x8x128xf32>
    %c0_7 = arith.constant 0 : index
    %c0_8 = arith.constant 0 : index
    %c0_9 = arith.constant 0 : index
    %13 = vector.load %arg4[%c0_7, %c0_8, %c0_9] : memref<1x8x128xf32, #tpu.memory_space<vmem>>, vector<1x8x128xf32>
    tpu.vector_store %arg4[%c0_7, %c0_8, %c0_9], %12 {strides = array<i32>} : memref<1x8x128xf32, #tpu.memory_space<vmem>>, vector<1x8x128xf32>,
    return
  }
  func.func @transform_0(%arg0: i32, %arg1: i32) -> (i32, i32) {
    %c1_i32 = arith.constant 1 : i32
    %0 = arith.muli %arg0, %c1_i32 : i32
    %1 = arith.addi %0, %arg1 : i32
    %c0_i32 = arith.constant 0 : i32
    %c0_i32_0 = arith.constant 0 : i32
    return %1, %c0_i32 : i32, i32
  }
  func.func @transform_1(%arg0: i32, %arg1: i32) -> (i32, i32) {
    %c1_i32 = arith.constant 1 : i32
    %0 = arith.muli %arg0, %c1_i32 : i32
    %1 = arith.addi %0, %arg1 : i32
    %c0_i32 = arith.constant 0 : i32
    %c0_i32_0 = arith.constant 0 : i32
    return %1, %c0_i32 : i32, i32
  }
  func.func @transform_2(%arg0: i32, %arg1: i32) -> (i32, i32, i32) {
    %c0_i32 = arith.constant 0 : i32
    %c0_i32_0 = arith.constant 0 : i32
    %c0_i32_1 = arith.constant 0 : i32
    return %arg0, %c0_i32, %c0_i32_0 : i32, i32, i32
  }
}

</mosaic_0001>

<bundles_post_ra>
// kernel: tpu_custom_call.1
= control target key start
LH: loop header
LB: loop body
LE: loop exit
PB: predicated region body
PF: predicated region fallthrough
CT: control target
= control target key end

     0   :  { %7 = vsyncpa [#allocation3], 0  ;;  %s200_s0 = inlined_call_operand.hbm [shape: f32[16,128], index: 0, kind: input, shape index: {}]   ;;  %s201_s1 = inlined_call_operand.hbm [shape: f32[16,128], index: 1, kind: input, shape index: {}]   ;;  %s202_s2 = inlined_call_operand.hbm [shape: f32[1,8,128], index: 2, kind: output, shape index: {}]  }
   0x1   :  { %8 = vsyncpa [#allocation6], 0 }
   0x2   :  { %9 = vsyncpa [#allocation4], 0  ;;  %s171_s9 = smov [#allocation2]  }
   0x3   :  { %s19_s10 = sshll.u32 %s171_s9, 4  ;;  %s20_s10 = int_to_ptr.vmem [resolvable:$true] %s19_s10 }
   0x4   :  { %s113_s11 = scalar_lea.vmem %s20_s10, 256  ;;  %p118_p1 = scmp.lt.s32.totalorder %s20_s10, %s20_s10 }
   0x5   :  { %p114_p0 = scmp.ne.s32.totalorder %s20_s10, %s113_s11  ;;  %p119_p2 = scmp.lt.s32.totalorder %s113_s11, %s113_s11 }
   0x7   :  { %p120_p3 = por %p119_p2, %p118_p1 }
   0x9   :  { %p121_p4 = pnand %p120_p3, %p114_p0 }
   0xb   :  { %124 = shalt.err (!%p121_p4)
}
   0xc   :  { %s172_s12 = smov 128   ;;  %s173_s13 = smov 8  }
   0xd   :  { %25 = dma.hbm_to_vmem [thread:$0]  %s200_s0, 256, %s20_s10, [#allocation3], %s172_s12, %s172_s12, %s173_s13  }
   0xe   :  { %s174_s16 = smov [#allocation5]  }
   0xf   :  { %s35_s17 = sshll.u32 %s174_s16, 4  ;;  %s36_s17 = int_to_ptr.vmem [resolvable:$true] %s35_s17 }
  0x10   :  { %s133_s18 = scalar_lea.vmem %s36_s17, 256  ;;  %p138_p6 = scmp.lt.s32.totalorder %s36_s17, %s36_s17 }
  0x11   :  { %p134_p5 = scmp.ne.s32.totalorder %s36_s17, %s133_s18  ;;  %p139_p7 = scmp.lt.s32.totalorder %s133_s18, %s133_s18 }
  0x13   :  { %p140_p8 = por %p139_p7, %p138_p6 }
  0x15   :  { %p141_p9 = pnand %p140_p8, %p134_p5 }
  0x17   :  { %144 = shalt.err (!%p141_p9)
}
  0x18   :  { %41 = dma.hbm_to_vmem [thread:$0]  %s201_s1, 256, %s36_s17, [#allocation6], %s172_s12, %s172_s12, %s173_s13  }
  0x19   :  { %165 = dma.done.wait [#allocation3], 256  }
  0x1a   :  { %166 = vsyncadd [#allocation3], 4294967040 }
  0x1b   :  { %167 = dma.done.wait [#allocation6], 256  }
  0x1c   :  { %168 = vsyncadd [#allocation6], 4294967040  ;;  %v57_v0 = vld [vmem:[#allocation2] sm:$0xff]  ;;  %v58_v1 = vld [vmem:[#allocation2 + $0x8] sm:$0xff]  ;;  %s175_s0 = smov [#allocation7]  }
  0x1d   :  { %97 = vrcp.f32 %v57_v0  ;;  %v59_v2 = vld [vmem:[#allocation5] sm:$0xff]  ;;  %v60_v3 = vld [vmem:[#allocation5 + $0x8] sm:$0xff]  ;;  %s81_s1 = sshll.u32 %s175_s0, 4  ;;  %s82_s1 = int_to_ptr.vmem [resolvable:$true] %s81_s1 }
  0x1e   :  { %99 = vrcp.f32 %v58_v1  ;;  %s145_s21 = scalar_lea.vmem %s82_s1, 128  ;;  %p150_p11 = scmp.lt.s32.totalorder %s82_s1, %s82_s1 }
  0x1f   :  { %101 = vlog2.f32 %v57_v0  ;;  %p146_p10 = scmp.ne.s32.totalorder %s82_s1, %s145_s21  ;;  %p151_p12 = scmp.lt.s32.totalorder %s145_s21, %s145_s21 }
  0x20   :  { %103 = vlog2.f32 %v58_v1 }
  0x21   :  { %p152_p13 = por %p151_p12, %p150_p11 }
  0x23   :  { %p153_p0 = pnand %p152_p13, %p146_p10 }
  0x2a   :  { %v98_v4 = vpop.eup %97 }
  0x2b   :  { %v100_v5 = vpop.eup %99  ;;  %v62_v6 = vmul.f32 %v98_v4, %v59_v2 }
  0x2c   :  { %v102_v7 = vpop.eup %101  ;;  %v64_v8 = vmul.f32 %v100_v5, %v60_v3 }
  0x2d   :  { %v104_v9 = vpop.eup %103  ;;  %v66_v10 = vmul.f32 0.6931472, %v102_v7 }
  0x2e   :  { %v68_v11 = vmul.f32 0.6931472, %v104_v9 }
  0x2f   :  { %v69_v12 = vadd.f32 %v66_v10, %v62_v6 }
  0x30   :  { %v70_v13 = vadd.f32 %v68_v11, %v64_v8 }
  0x32   :  { %v71_v14 = vadd.f32 %v70_v13, %v69_v12 }
  0x34   :  { %74 = vst [vmem:[#allocation7] sm:$0xff] %v71_v14 }
  0x35   :  { %156 = shalt.err (!%p153_p0)
}
  0x36   :  { %84 = dma.vmem_to_hbm [thread:$0]  %s82_s1, 128, %s202_s2, [#allocation4]  }
  0x37   :  { %169 = dma.done.wait [#allocation4], 128  }
  0x38   :  { %170 = vsyncadd [#allocation4], 4294967168 }
  0x39   :  { %88 = vsyncpa [#allocation3], 1 }
  0x3a   :  { %89 = vsyncpa [#allocation6], 1 }
  0x3b   :  { %90 = vsyncpa [#allocation4], 1 }

</bundles_post_ra>
